<compile_context>
chip_gen: v6e
topology: v6e:2x2x1
jax: 0.10.0
libtpu: 0.0.40
codegen_flags: <defaults>
</compile_context>

<pallas_src>
import functools

import jax
import jax.numpy as jnp
from jax.experimental import pallas as pl
from jax.experimental.pallas import tpu as pltpu

_SUBLANE = 8
_MIB = 1024 * 1024


def _round_up(x, m):
    return ((x + m - 1) // m) * m


def _cdiv(a, b):
    return -(-a // b)


def _lane_align(dtype):
    # 16-bit weights: pad feature dims to 256 so v6e/v7x 2x256^2 MXU passes are
    # fully filled.  f32: 128 (lane width / v5e 128^2 MXU native).
    return 256 if jnp.dtype(dtype).itemsize <= 2 else 128


def _autoencoder_kernel(x_ref, we_ref, be_ref, wd_ref, bd_ref, o_ref):
    # Encoder: (TB, Dp) @ (Dp, Hp) + (1, Hp), f32 accumulation on the MXU.
    h = jnp.dot(x_ref[...], we_ref[...], preferred_element_type=jnp.float32)
    h = h + be_ref[...].astype(jnp.float32)
    # Feed the decoder matmul the MXU-native input dtype (e.g. bf16) while
    # still accumulating in f32.  No-op for f32 weights.
    if wd_ref.dtype != jnp.float32:
        h = h.astype(wd_ref.dtype)
    # Decoder: (TB, Hp) @ (Hp, Dp) + (1, Dp).
    y = jnp.dot(h, wd_ref[...], preferred_element_type=jnp.float32)
    y = y + bd_ref[...].astype(jnp.float32)
    o_ref[...] = y.astype(o_ref.dtype)


def prepare_params(w_enc, b_enc, w_dec, b_dec):
    """Zero-pad feature dims to lane-dense multiples ONCE (hoisted out of the
    forward).  Zero padding is mathematically a no-op for both matmuls and
    biases; the pad is sliced off after the kernel."""
    D_in, H = w_enc.shape
    align = _lane_align(w_enc.dtype)
    Dp = _round_up(D_in, align)
    Hp = _round_up(H, align)
    wep = jnp.pad(w_enc, ((0, Dp - D_in), (0, Hp - H)))
    bep = jnp.pad(b_enc.reshape(1, H), ((0, 0), (0, Hp - H)))
    wdp = jnp.pad(w_dec, ((0, Hp - H), (0, Dp - D_in)))
    bdp = jnp.pad(b_dec.reshape(1, D_in), ((0, 0), (0, Dp - D_in)))
    return wep, bep, wdp, bdp


def _vmem_limit(footprint_bytes, budget_bytes):
    # Explicit scoped-VMEM limit sized from the footprint (+50% / +4 MiB
    # compiler headroom), floored at 32 MiB (>= every generation's default,
    # <= v7x's 64 MiB physical) and capped at the configured budget.
    return int(min(budget_bytes, max(int(footprint_bytes * 1.5) + 4 * _MIB, 32 * _MIB)))


@functools.partial(jax.jit, static_argnames=("d_in", "batch_tile", "vmem_budget_bytes"))
def autoencoder_forward(x, wep, bep, wdp, bdp, *, d_in,
                        batch_tile=512, vmem_budget_bytes=48 * _MIB):
    """x: (B, d_in); padded params from `prepare_params`. Returns (B, d_in)."""
    B, D = x.shape
    Dp, Hp = wep.shape
    assert D == d_in, "x feature dim must match the original input_dim"
    assert wdp.shape == (Hp, Dp) and bep.shape == (1, Hp) and bdp.shape == (1, Dp)
    assert batch_tile % _SUBLANE == 0, "batch_tile must be a multiple of 8"

    x_item = jnp.dtype(x.dtype).itemsize
    w_item = jnp.dtype(wep.dtype).itemsize
    out_dtype = x.dtype
    out_item = jnp.dtype(out_dtype).itemsize

    # Pad x's feature dim only when actually ragged (fast path when aligned).
    xp = x if D == Dp else jnp.pad(x, ((0, 0), (0, Dp - D)))

    weight_bytes = 2 * Dp * Hp * w_item + (Hp + Dp) * w_item
    budget = int(0.85 * vmem_budget_bytes)

    # ---- Small-batch, no-grid path: whole operands resident in VMEM, no
    #      pipelining (removes the ~0.35 us / ~600-cycle per-step overhead).
    #      Gated on the actual byte footprint, not just B. ----
    small_footprint = (B * Dp * (x_item + out_item)      # x + out
                       + weight_bytes                    # weights + biases
                       + B * Hp * 4 + B * Dp * 4)        # f32 intermediates h, y
    if B <= batch_tile and small_footprint <= budget:
        out_p = pl.pallas_call(
            _autoencoder_kernel,
            out_shape=jax.ShapeDtypeStruct((B, Dp), out_dtype),
            in_specs=[pl.BlockSpec(memory_space=pltpu.MemorySpace.VMEM)] * 5,
            out_specs=pl.BlockSpec(memory_space=pltpu.MemorySpace.VMEM),
            compiler_params=pltpu.CompilerParams(
                vmem_limit_bytes=_vmem_limit(small_footprint, vmem_budget_bytes)),
        )(xp, wep, bep, wdp, bdp)
        return out_p if D == Dp else out_p[:, :d_in]

    # ---- Large-batch path: tile ONLY the batch axis; weights stay resident
    #      (single-buffered), only x / out stream from HBM. ----
    # Balanced tile so the last tile isn't nearly empty for awkward B.
    n_tiles = max(1, _cdiv(B, batch_tile))
    tb_balanced = _round_up(_cdiv(B, n_tiles), _SUBLANE)
    # Per-row streamed / intermediate bytes: x + out double-buffered, f32 h & y.
    per_row = 2 * Dp * x_item + 2 * Dp * out_item + Hp * 4 + Dp * 4
    tb_budget = max(_SUBLANE,
                    ((budget - weight_bytes) // max(per_row, 1)) // _SUBLANE * _SUBLANE)
    TB = max(_SUBLANE, min(tb_balanced, tb_budget, _round_up(batch_tile, _SUBLANE)))

    Bp = _round_up(B, TB)
    if Bp != B:
        xp = jnp.pad(xp, ((0, Bp - B), (0, 0)))

    grid_footprint = TB * per_row + weight_bytes

    out_p = pl.pallas_call(
        _autoencoder_kernel,
        out_shape=jax.ShapeDtypeStruct((Bp, Dp), out_dtype),
        grid=(Bp // TB,),
        in_specs=[
            # x: streamed per batch tile (default 2-deep double buffering).
            pl.BlockSpec((TB, Dp), lambda i: (i, 0)),
            # Resident operands: constant index_map + single buffer (no dead
            # second VMEM copy of each weight).
            pl.BlockSpec((Dp, Hp), lambda i: (0, 0), pipeline_mode=pl.Buffered(1)),
            pl.BlockSpec((1, Hp), lambda i: (0, 0), pipeline_mode=pl.Buffered(1)),
            pl.BlockSpec((Hp, Dp), lambda i: (0, 0), pipeline_mode=pl.Buffered(1)),
            pl.BlockSpec((1, Dp), lambda i: (0, 0), pipeline_mode=pl.Buffered(1)),
        ],
        out_specs=pl.BlockSpec((TB, Dp), lambda i: (i, 0)),
        compiler_params=pltpu.CompilerParams(
            # Batch tiles are independent -> shard across v7x's 2 TensorCores
            # (near-neutral on v5e/v6e).
            dimension_semantics=("parallel",),
            vmem_limit_bytes=_vmem_limit(grid_footprint, vmem_budget_bytes),
        ),
    )(xp, wep, bep, wdp, bdp)

    if Bp == B and Dp == D:
        return out_p
    return out_p[:B, :d_in]


def init_params(key, input_dim, hidden_dim, dtype=jnp.float32):
    """Deterministic init mirroring nn.Linear's U(-1/sqrt(fan_in), +1/sqrt(fan_in)).
    Weights stored pre-transposed relative to PyTorch's (out, in) layout."""
    k1, k2, k3, k4 = jax.random.split(key, 4)
    bound_e = 1.0 / (input_dim ** 0.5)
    bound_d = 1.0 / (hidden_dim ** 0.5)
    w_enc = jax.random.uniform(k1, (input_dim, hidden_dim), dtype, -bound_e, bound_e)
    b_enc = jax.random.uniform(k2, (hidden_dim,), dtype, -bound_e, bound_e)
    w_dec = jax.random.uniform(k3, (hidden_dim, input_dim), dtype, -bound_d, bound_d)
    b_dec = jax.random.uniform(k4, (input_dim,), dtype, -bound_d, bound_d)
    return w_enc, b_enc, w_dec, b_dec


if __name__ == "__main__":
    batch, input_dim, hidden_dim = 8, 64, 32

    key = jax.random.PRNGKey(0)
    kx, kp = jax.random.split(key)
    x = jax.random.normal(kx, (batch, input_dim), dtype=jnp.float32)
    w_enc, b_enc, w_dec, b_dec = init_params(kp, input_dim, hidden_dim)

    # Pad weights ONCE (hoisted out of the forward).
    wep, bep, wdp, bdp = prepare_params(w_enc, b_enc, w_dec, b_dec)

    def reference(xx):
        return (xx @ w_enc + b_enc) @ w_dec + b_dec

    # 1) Small-batch (no-grid, whole-VMEM) path.
    out = autoencoder_forward(x, wep, bep, wdp, bdp, d_in=input_dim)
    out = jax.block_until_ready(out)
    assert out.shape == (batch, input_dim)
    assert jnp.allclose(out, reference(x), atol=1e-5, rtol=1e-5)

    # 2) Batch-tiled (grid) path, exercised with a tiny tile: B = 48, TB = 16.
    x2 = jax.random.normal(kx, (48, input_dim), dtype=jnp.float32)
    out2 = autoencoder_forward(x2, wep, bep, wdp, bdp, d_in=input_dim, batch_tile=16)
    out2 = jax.block_until_ready(out2)
    assert out2.shape == (48, input_dim)
    assert jnp.allclose(out2, reference(x2), atol=1e-5, rtol=1e-5)

    # 3) Ragged batch on the grid path (exercises balanced TB + batch pad/slice).
    x3 = jax.random.normal(kx, (40, input_dim), dtype=jnp.float32)
    out3 = autoencoder_forward(x3, wep, bep, wdp, bdp, d_in=input_dim, batch_tile=16)
    out3 = jax.block_until_ready(out3)
    assert out3.shape == (40, input_dim)
    assert jnp.allclose(out3, reference(x3), atol=1e-5, rtol=1e-5)

    print("KERNEL_OK")
</pallas_src>

<mosaic_0001>
module attributes {stable_mosaic.version = 11 : i64} {
  func.func @_autoencoder_kernel(%arg0: memref<8x128xf32, #tpu.memory_space<vmem>>, %arg1: memref<128x128xf32, #tpu.memory_space<vmem>>, %arg2: memref<1x128xf32, #tpu.memory_space<vmem>>, %arg3: memref<128x128xf32, #tpu.memory_space<vmem>>, %arg4: memref<1x128xf32, #tpu.memory_space<vmem>>, %arg5: memref<8x128xf32, #tpu.memory_space<vmem>>) attributes {dimension_semantics = [], scalar_prefetch = 0 : i64, scratch_operands = 0 : i64, tpu.core_type = #tpu.core_type<tc>} {
    %c0 = arith.constant 0 : index
    %c0_0 = arith.constant 0 : index
    %0 = vector.load %arg0[%c0, %c0_0] : memref<8x128xf32, #tpu.memory_space<vmem>>, vector<8x128xf32>
    %c0_1 = arith.constant 0 : index
    %c0_2 = arith.constant 0 : index
    %1 = vector.load %arg1[%c0_1, %c0_2] : memref<128x128xf32, #tpu.memory_space<vmem>>, vector<128x128xf32>
    %cst = arith.constant dense<0.000000e+00> : vector<8x128xf32>
    %2 = tpu.matmul %0, %1, %cst {dimension_numbers = #tpu.dot_dimension_numbers<[1], [0], [0], [1], [0, 0, 1, 1], [], []>} : vector<8x128xf32>, vector<128x128xf32>, vector<8x128xf32> -> vector<8x128xf32>
    %c0_3 = arith.constant 0 : index
    %c0_4 = arith.constant 0 : index
    %3 = vector.load %arg2[%c0_3, %c0_4] : memref<1x128xf32, #tpu.memory_space<vmem>>, vector<1x128xf32>
    %4 = vector.broadcast %3 : vector<1x128xf32> to vector<8x128xf32>
    %5 = arith.addf %2, %4 : vector<8x128xf32>
    %c0_5 = arith.constant 0 : index
    %c0_6 = arith.constant 0 : index
    %6 = vector.load %arg3[%c0_5, %c0_6] : memref<128x128xf32, #tpu.memory_space<vmem>>, vector<128x128xf32>
    %cst_7 = arith.constant dense<0.000000e+00> : vector<8x128xf32>
    %7 = tpu.matmul %5, %6, %cst_7 {dimension_numbers = #tpu.dot_dimension_numbers<[1], [0], [0], [1], [0, 0, 1, 1], [], []>} : vector<8x128xf32>, vector<128x128xf32>, vector<8x128xf32> -> vector<8x128xf32>
    %c0_8 = arith.constant 0 : index
    %c0_9 = arith.constant 0 : index
    %8 = vector.load %arg4[%c0_8, %c0_9] : memref<1x128xf32, #tpu.memory_space<vmem>>, vector<1x128xf32>
    %9 = vector.broadcast %8 : vector<1x128xf32> to vector<8x128xf32>
    %10 = arith.addf %7, %9 : vector<8x128xf32>
    %c0_10 = arith.constant 0 : index
    %c0_11 = arith.constant 0 : index
    %11 = vector.load %arg5[%c0_10, %c0_11] : memref<8x128xf32, #tpu.memory_space<vmem>>, vector<8x128xf32>
    tpu.vector_store %arg5[%c0_10, %c0_11], %10 {strides = array<i32>} : memref<8x128xf32, #tpu.memory_space<vmem>>, vector<8x128xf32>,
    return
  }
}

</mosaic_0001>

<bundles_post_ra>
// kernel: autoencoder_forward.1
= control target key start
LH: loop header
LB: loop body
LE: loop exit
PB: predicated region body
PF: predicated region fallthrough
CT: control target
= control target key end

     0   :  { %10 = vsyncpa [#allocation3], 0  ;;  %s521_s0 = inlined_call_operand.vmem [shape: f32[8,128], index: 0, kind: input, shape index: {}]   ;;  %s522_s1 = inlined_call_operand.hbm [shape: f32[128,128], index: 1, kind: input, shape index: {}]   ;;  %s523_s2 = inlined_call_operand.vmem [shape: f32[1,128], index: 2, kind: input, shape index: {}]   ;;  %s524_s3 = inlined_call_operand.hbm [shape: f32[128,128], index: 3, kind: input, shape index: {}]   ;;  %s525_s4 = inlined_call_operand.vmem [shape: f32[1,128], index: 4, kind: input, shape index: {}]   ;;  %s526_s5 = inlined_call_operand.hbm [shape: f32[8,128], index: 5, kind: output, shape index: {}]  }
   0x1   :  { %11 = vsyncpa [#allocation6], 0 }
   0x2   :  { %12 = vsyncpa [#allocation4], 0  ;;  %s432_s18 = smov [#allocation2]  }
   0x3   :  { %s20_s19 = sshll.u32 %s432_s18, 4  ;;  %s21_s19 = int_to_ptr.vmem [resolvable:$true] %s20_s19 }
   0x4   :  { %s374_s20 = scalar_lea.vmem %s21_s19, 2048  ;;  %p379_p1 = scmp.lt.s32.totalorder %s21_s19, %s21_s19 }
   0x5   :  { %p375_p0 = scmp.ne.s32.totalorder %s21_s19, %s374_s20  ;;  %p380_p2 = scmp.lt.s32.totalorder %s374_s20, %s374_s20 }
   0x7   :  { %p381_p3 = por %p380_p2, %p379_p1 }
   0x9   :  { %p382_p4 = pnand %p381_p3, %p375_p0 }
   0xb   :  { %385 = shalt.err (!%p382_p4)
}
   0xc   :  { %s433_s21 = smov 128   ;;  %s434_s22 = smov 8  }
   0xd   :  { %26 = dma.hbm_to_vmem [thread:$0]  %s522_s1, 2048, %s21_s19, [#allocation3], %s433_s21, %s433_s21, %s434_s22  }
   0xe   :  { %s435_s25 = smov [#allocation5]  }
   0xf   :  { %s34_s26 = sshll.u32 %s435_s25, 4  ;;  %s35_s26 = int_to_ptr.vmem [resolvable:$true] %s34_s26 }
  0x10   :  { %s394_s27 = scalar_lea.vmem %s35_s26, 2048  ;;  %p399_p6 = scmp.lt.s32.totalorder %s35_s26, %s35_s26 }
  0x11   :  { %p395_p5 = scmp.ne.s32.totalorder %s35_s26, %s394_s27  ;;  %p400_p7 = scmp.lt.s32.totalorder %s394_s27, %s394_s27 }
  0x13   :  { %p401_p8 = por %p400_p7, %p399_p6 }
  0x15   :  { %p402_p9 = pnand %p401_p8, %p395_p5 }
  0x17   :  { %405 = shalt.err (!%p402_p9)
}
  0x18   :  { %40 = dma.hbm_to_vmem [thread:$0]  %s524_s3, 2048, %s35_s26, [#allocation6], %s433_s21, %s433_s21, %s434_s22  }
  0x19   :  { %426 = dma.done.wait [#allocation3], 2048  }
  0x1a   :  { %427 = vsyncadd [#allocation3], 4294965248 }
  0x1b   :  { %428 = dma.done.wait [#allocation6], 2048  }
  0x1c   :  { %429 = vsyncadd [#allocation6], 4294965248  ;;  %v436_v0 = vmov 0.0   ;;  %vm437_vm0 = vmmov 0   ;;  %v65_v1 = vld [vmem:[#allocation2 + $0x78] sm:$0xff]  ;;  %v64_v2 = vld [vmem:[#allocation2 + $0x70] sm:$0xff] }
  0x1d   :  { %289 = vmatprep.subr.mxu0 %v436_v0  ;;  %321 = vmatprep.mubr.msk.f32.mxu0 %vm437_vm0, %v436_v0  ;;  %v63_v3 = vld [vmem:[#allocation2 + $0x68] sm:$0xff]  ;;  %v62_v4 = vld [vmem:[#allocation2 + $0x60] sm:$0xff]  ;;  %v158_v5 = vld [vmem:[#allocation5 + $0x78] sm:$0xff]  ;;  %s438_s8 = smov [#allocation7]  }
  0x1e   :  { %324 = vmatprep.subr.mxu1 %v436_v0  ;;  %356 = vmatprep.mubr.msk.f32.mxu1 %vm437_vm0, %v436_v0  ;;  %v61_v6 = vld [vmem:[#allocation2 + $0x58] sm:$0xff]  ;;  %v157_v7 = vld [vmem:[#allocation5 + $0x70] sm:$0xff]  ;;  %v156_v8 = vld [vmem:[#allocation5 + $0x68] sm:$0xff]  ;;  %s243_s9 = sshll.u32 %s438_s8, 4  ;;  %s244_s9 = int_to_ptr.vmem [resolvable:$true] %s243_s9 }
  0x1f   :  { %290 = vmatpush3.msra.mxu0 %v65_v1  ;;  %325 = vmatpush3.msra.mxu1 %v158_v5  ;;  %v60_v9 = vld [vmem:[#allocation2 + $0x50] sm:$0xff]  ;;  %v155_v10 = vld [vmem:[#allocation5 + $0x60] sm:$0xff]  ;;  %v59_v11 = vld [vmem:[#allocation2 + $0x48] sm:$0xff]  ;;  %s406_s10 = scalar_lea.vmem %s244_s9, 128  ;;  %p411_p11 = scmp.lt.s32.totalorder %s244_s9, %s244_s9 }
  0x20   :  { %291 = vmatprep.subr.mxu0 %v436_v0  ;;  %326 = vmatprep.subr.mxu1 %v436_v0  ;;  %v154_v12 = vld [vmem:[#allocation5 + $0x58] sm:$0xff]  ;;  %v58_v13 = vld [vmem:[#allocation2 + $0x40] sm:$0xff]  ;;  %v153_v14 = vld [vmem:[#allocation5 + $0x50] sm:$0xff]  ;;  %p407_p10 = scmp.ne.s32.totalorder %s244_s9, %s406_s10  ;;  %p412_p12 = scmp.lt.s32.totalorder %s406_s10, %s406_s10 }
  0x21   :  { %292 = vmatpush3.msra.mxu0 %v64_v2  ;;  %327 = vmatpush3.msra.mxu1 %v157_v7  ;;  %v57_v15 = vld [vmem:[#allocation2 + $0x38] sm:$0xff]  ;;  %v152_v16 = vld [vmem:[#allocation5 + $0x48] sm:$0xff]  ;;  %v56_v17 = vld [vmem:[#allocation2 + $0x30] sm:$0xff] }
  0x22   :  { %293 = vmatprep.subr.mxu0 %v436_v0  ;;  %328 = vmatprep.subr.mxu1 %v436_v0  ;;  %v151_v18 = vld [vmem:[#allocation5 + $0x40] sm:$0xff]  ;;  %v55_v19 = vld [vmem:[#allocation2 + $0x28] sm:$0xff]  ;;  %v150_v20 = vld [vmem:[#allocation5 + $0x38] sm:$0xff]  ;;  %p413_p13 = por %p412_p12, %p411_p11 }
  0x23   :  { %294 = vmatpush3.msra.mxu0 %v63_v3  ;;  %329 = vmatpush3.msra.mxu1 %v156_v8  ;;  %v54_v21 = vld [vmem:[#allocation2 + $0x20] sm:$0xff]  ;;  %v149_v22 = vld [vmem:[#allocation5 + $0x30] sm:$0xff]  ;;  %v53_v23 = vld [vmem:[#allocation2 + $0x18] sm:$0xff] }
  0x24   :  { %295 = vmatprep.subr.mxu0 %v436_v0  ;;  %330 = vmatprep.subr.mxu1 %v436_v0  ;;  %v148_v24 = vld [vmem:[#allocation5 + $0x28] sm:$0xff]  ;;  %v52_v25 = vld [vmem:[#allocation2 + $0x10] sm:$0xff]  ;;  %v147_v26 = vld [vmem:[#allocation5 + $0x20] sm:$0xff]  ;;  %p414_p0 = pnand %p413_p13, %p407_p10 }
  0x25   :  { %296 = vmatpush3.msra.mxu0 %v62_v4  ;;  %331 = vmatpush3.msra.mxu1 %v155_v10  ;;  %v51_v27 = vld [vmem:[#allocation2 + $0x8] sm:$0xff]  ;;  %v146_v28 = vld [vmem:[#allocation5 + $0x18] sm:$0xff]  ;;  %v50_v29 = vld [vmem:[#allocation2] sm:$0xff] }
  0x26   :  { %297 = vmatprep.subr.mxu0 %v436_v0  ;;  %332 = vmatprep.subr.mxu1 %v436_v0  ;;  %v49_v30 = vld [vmem:[%s521_s0] sm:$0xff]  ;;  %v145_v31 = vld [vmem:[#allocation5 + $0x10] sm:$0xff]  ;;  %v144_v32 = vld [vmem:[#allocation5 + $0x8] sm:$0xff] }
  0x27   :  { %298 = vmatpush3.msra.mxu0 %v61_v6  ;;  %333 = vmatpush3.msra.mxu1 %v154_v12  ;;  %v143_v33 = vld [vmem:[#allocation5] sm:$0xff] }
  0x28   :  { %299 = vmatprep.subr.mxu0 %v436_v0  ;;  %334 = vmatprep.subr.mxu1 %v436_v0  ;;  %v253_v34 = vld [vmem:[%s523_s2] ss:$0 sm:$0xff] }
  0x29   :  { %300 = vmatpush3.msra.mxu0 %v60_v9  ;;  %335 = vmatpush3.msra.mxu1 %v153_v14  ;;  %v254_v38 = vld [vmem:[%s525_s4] ss:$0 sm:$0xff] }
  0x2a   :  { %301 = vmatprep.subr.mxu0 %v436_v0  ;;  %336 = vmatprep.subr.mxu1 %v436_v0 }
  0x2b   :  { %302 = vmatpush3.msra.mxu0 %v59_v11  ;;  %337 = vmatpush3.msra.mxu1 %v152_v16 }
  0x2c   :  { %303 = vmatprep.subr.mxu0 %v436_v0  ;;  %338 = vmatprep.subr.mxu1 %v436_v0 }
  0x2d   :  { %304 = vmatpush3.msra.mxu0 %v58_v13  ;;  %339 = vmatpush3.msra.mxu1 %v151_v18 }
  0x2e   :  { %305 = vmatprep.subr.mxu0 %v436_v0  ;;  %340 = vmatprep.subr.mxu1 %v436_v0 }
  0x2f   :  { %306 = vmatpush3.msra.mxu0 %v57_v15  ;;  %341 = vmatpush3.msra.mxu1 %v150_v20 }
  0x30   :  { %307 = vmatprep.subr.mxu0 %v436_v0  ;;  %342 = vmatprep.subr.mxu1 %v436_v0 }
  0x31   :  { %308 = vmatpush3.msra.mxu0 %v56_v17  ;;  %343 = vmatpush3.msra.mxu1 %v149_v22 }
  0x32   :  { %309 = vmatprep.subr.mxu0 %v436_v0  ;;  %344 = vmatprep.subr.mxu1 %v436_v0 }
  0x33   :  { %310 = vmatpush3.msra.mxu0 %v55_v19  ;;  %345 = vmatpush3.msra.mxu1 %v148_v24 }
  0x34   :  { %311 = vmatprep.subr.mxu0 %v436_v0  ;;  %346 = vmatprep.subr.mxu1 %v436_v0 }
  0x35   :  { %312 = vmatpush3.msra.mxu0 %v54_v21  ;;  %347 = vmatpush3.msra.mxu1 %v147_v26 }
  0x36   :  { %313 = vmatprep.subr.mxu0 %v436_v0  ;;  %348 = vmatprep.subr.mxu1 %v436_v0 }
  0x37   :  { %314 = vmatpush3.msra.mxu0 %v53_v23  ;;  %349 = vmatpush3.msra.mxu1 %v146_v28 }
  0x38   :  { %315 = vmatprep.subr.mxu0 %v436_v0  ;;  %350 = vmatprep.subr.mxu1 %v436_v0 }
  0x39   :  { %316 = vmatpush3.msra.mxu0 %v52_v25  ;;  %351 = vmatpush3.msra.mxu1 %v145_v31 }
  0x3a   :  { %317 = vmatprep.subr.mxu0 %v436_v0  ;;  %352 = vmatprep.subr.mxu1 %v436_v0 }
  0x3b   :  { %318 = vmatpush3.msra.mxu0 %v51_v27  ;;  %353 = vmatpush3.msra.mxu1 %v144_v32 }
  0x3c   :  { %319 = vmatprep.subr.mxu0 %v436_v0  ;;  %354 = vmatprep.subr.mxu1 %v436_v0 }
  0x3d   :  { %320 = vmatpush3.msra.mxu0 %v50_v29  ;;  %355 = vmatpush3.msra.mxu1 %v143_v33 }
  0x3e   :  { %322 = vmatmul.mubr.f32.vlgmr.msra.gmra.mxu0 %v49_v30 }
  0xfe   :  { %v139_v35 = vpop.f32.mrf.mxu0 }
  0xff   :  { %v140_v36 = vadd.f32 %v253_v34, %v139_v35 }
 0x100   :  { %v323_v37 = vpop.f32.mrf.mxu0 }
 0x101   :  { %357 = vmatmul.mubr.f32.vlgmr.msra.gmra.mxu1 %v140_v36 }
 0x1c1   :  { %v232_v39 = vpop.f32.mrf.mxu1 }
 0x1c2   :  { %v233_v40 = vadd.f32 %v254_v38, %v232_v39 }
 0x1c3   :  { %v358_v41 = vpop.f32.mrf.mxu1 }
 0x1c4   :  { %236 = vst [vmem:[#allocation7] sm:$0xff] %v233_v40 }
 0x1c5   :  { %417 = shalt.err (!%p414_p0)
}
 0x1c6   :  { %246 = dma.vmem_to_hbm [thread:$0]  %s244_s9, 128, %s526_s5, [#allocation4]  }
 0x1c7   :  { %430 = dma.done.wait [#allocation4], 128  }
 0x1c8   :  { %431 = vsyncadd [#allocation4], 4294967168 }
 0x1c9   :  { %250 = vsyncpa [#allocation3], 1 }
 0x1ca   :  { %251 = vsyncpa [#allocation6], 1 }
 0x1cb   :  { %252 = vsyncpa [#allocation4], 1 }

</bundles_post_ra>
